<compile_context>
chip_gen: v7x
topology: tpu7x:2x2x1
jax: 0.10.0
libtpu: 0.0.40
codegen_flags: <defaults>
</compile_context>

<pallas_src>
import functools

import jax
import jax.numpy as jnp
from jax import lax
from jax.experimental import pallas as pl
from jax.experimental.pallas import tpu as pltpu

_E4M3_MAX = 448.0          # max finite |value| of float8_e4m3fn
_MIN_NORMAL = 1.0 / 64.0   # 2^-6, smallest normal e4m3 magnitude
_MAGIC = 16384.0           # 2^14: ulp(2^14) in f32 == 2^-9 -> RNE onto subnormal grid
_LANE = 128

# Working-set budget per grid step (double-buffered input + output tiles).
# 24 MiB sits under the 32 MiB scoped-VMEM limit requested below on every
# generation (v5e/v6e physical VMEM 128 MiB, v7x 64 MiB per TensorCore).
_TARGET_VMEM_BYTES = 24 * 1024 * 1024
_VMEM_LIMIT_BYTES = 32 * 1024 * 1024


def _round_up(x, m):
    return -(-x // m) * m


def _row_align(*dtypes):
    """Sublane alignment of the row tile: 8 for f32, 16 for bf16, 32 for 8-bit."""
    min_bytes = min(jnp.dtype(d).itemsize for d in dtypes)
    return 32 // min_bytes


def _use_native_fp8_default():
    """Use the native fp8 cast only on v7x-family chips (fp8 MXU/convert support)."""
    try:
        kind = jax.devices()[0].device_kind.lower()
    except Exception:
        return False
    return ("v7" in kind) or ("7x" in kind)


def _quantize_emulated(v, *, assume_finite, bitcast):
    """fp8-e4m3fn quantization (saturating, RNE) of f32 `v`; result exact in f32."""
    bits_v = bitcast(v, jnp.uint32)
    sign_bits = bits_v & jnp.uint32(0x80000000)

    # |v| saturated at 448 (matches HPU cast_to_fp8_v2 saturation; inf -> 448).
    a = bitcast(bits_v & jnp.uint32(0x7FFFFFFF), jnp.float32)
    a = jnp.minimum(a, _E4M3_MAX)

    # Normal range: round-to-nearest-even to 3 mantissa bits via add-and-mask.
    abits = bitcast(a, jnp.uint32)
    lsb = (abits >> 20) & jnp.uint32(1)
    rounded = (abits + jnp.uint32(0x0007FFFF) + lsb) & jnp.uint32(0xFFF00000)

    # Subnormal range (|a| < 2^-6): RNE onto multiples of 2^-9 via magic add.
    sub_bits = bitcast((a + _MAGIC) - _MAGIC, jnp.uint32)

    q_bits = jnp.where(a < _MIN_NORMAL, sub_bits, rounded) | sign_bits
    if not assume_finite:
        q_bits = jnp.where(v != v, bits_v, q_bits)   # NaN passthrough
    return bitcast(q_bits, jnp.float32)


def _quantize_native(v, *, assume_finite):
    """Native fp8 round trip (v7x): clip saturates (inf -> 448), cast is RNE."""
    q = jnp.clip(v, -_E4M3_MAX, _E4M3_MAX)
    q = q.astype(jnp.float8_e4m3fn).astype(jnp.float32)
    if not assume_finite:
        q = jnp.where(v != v, v, q)                  # NaN passthrough
    return q


def _qdq_kernel(x_ref, o_ref, *, scale_inv, scale, quantize):
    v = x_ref[...].astype(jnp.float32) * scale_inv
    o_ref[...] = (quantize(v) * scale).astype(o_ref.dtype)


def _choose_width(n, row_align):
    """Widest lane-dense width dividing n; prefer widths leaving >= 2*row_align rows
    so the row grid can be split across two TensorCores. None if 128 doesn't divide n."""
    divs = [w for w in (8 * _LANE, 4 * _LANE, 2 * _LANE, _LANE) if n % w == 0]
    if not divs:
        return None
    for w in divs:
        if n // w >= 2 * row_align:
            return w
    return divs[0]


def _pick_tile_rows(rows, width, row_align, in_bytes, out_bytes):
    budget_elems = _TARGET_VMEM_BYTES // (2 * (in_bytes + out_bytes))
    max_rows = max(row_align, (budget_elems // width) // row_align * row_align)
    if rows > max_rows:
        return max_rows
    if rows > row_align:
        # Emit >= 2 grid steps so dimension_semantics=("parallel",) can shard the
        # row loop across both v7x TensorCores even when one tile would fit.
        return min(max_rows, _round_up((rows + 1) // 2, row_align))
    return rows                          # tiny tensor: single full-dims block


def quant_dequant(x, scale_inv, hp_dtype=jnp.bfloat16, *, assume_finite=False,
                  use_native_fp8=None):
    """Quantize x to fp8-e4m3fn (saturating RNE) and dequantize back to hp_dtype.

    Mirrors neural_compressor QuantDequant.forward:
        y = cast_to_fp8(x * scale_inv); z = cast_from_fp8(y) * (1 / scale_inv)
    """
    if use_native_fp8 is None:
        use_native_fp8 = _use_native_fp8_default()

    # ScaleFormat.CONST: scales are compile-time constants baked into the kernel
    # (no SMEM operands, no host-side divide).
    # TODO(synk): dynamic (traced) scales would need a (1,1) SMEM operand instead.
    scale_inv_c = float(scale_inv)
    scale_c = 1.0 / scale_inv_c

    if use_native_fp8:
        quantize = functools.partial(_quantize_native, assume_finite=assume_finite)
        host_quantize = quantize
        flops_per_elem = 6
    else:
        quantize = functools.partial(_quantize_emulated, assume_finite=assume_finite,
                                     bitcast=pltpu.bitcast)
        host_quantize = functools.partial(_quantize_emulated,
                                          assume_finite=assume_finite,
                                          bitcast=lax.bitcast_convert_type)
        flops_per_elem = 16

    orig_shape = x.shape
    flat = x.reshape(-1)                 # contiguous reshape: free (no HBM pass)
    n = flat.shape[0]
    row_align = _row_align(x.dtype, hp_dtype)
    in_bytes = jnp.dtype(x.dtype).itemsize
    out_bytes = jnp.dtype(hp_dtype).itemsize

    width = _choose_width(n, row_align)
    bulk = n if width is not None else (n // _LANE) * _LANE
    if width is None:
        width = _LANE

    parts = []
    if bulk:
        rows = bulk // width
        x2 = (flat if bulk == n else flat[:bulk]).reshape(rows, width)
        tile_r = _pick_tile_rows(rows, width, row_align, in_bytes, out_bytes)
        grid = (pl.cdiv(rows, tile_r),)

        cost = pl.CostEstimate(flops=flops_per_elem * bulk, transcendentals=0,
                               bytes_accessed=bulk * (in_bytes + out_bytes))
        kernel = functools.partial(_qdq_kernel, scale_inv=scale_inv_c,
                                   scale=scale_c, quantize=quantize)

        out = pl.pallas_call(
            kernel,
            out_shape=jax.ShapeDtypeStruct((rows, width), hp_dtype),
            grid=grid,
            in_specs=[pl.BlockSpec((tile_r, width), lambda i: (i, 0))],
            out_specs=pl.BlockSpec((tile_r, width), lambda i: (i, 0)),
            compiler_params=pltpu.CompilerParams(
                dimension_semantics=("parallel",),      # megacore / v7x dual-TC
                vmem_limit_bytes=_VMEM_LIMIT_BYTES),
            cost_estimate=cost,
        )(x2)
        parts.append(out.reshape(-1))

    if bulk != n:
        # <128-element ragged tail handled in plain jnp — avoids the previous
        # full-tensor pad + slice HBM passes; only the tiny tail plus one output
        # concat are touched, and only for non-128-multiple sizes.
        vt = flat[bulk:].astype(jnp.float32) * scale_inv_c
        parts.append((host_quantize(vt) * scale_c).astype(hp_dtype))

    out_flat = parts[0] if len(parts) == 1 else jnp.concatenate(parts)
    return out_flat.reshape(orig_shape)


if __name__ == "__main__":
    key = jax.random.PRNGKey(0)
    # Small NCHW activation tensor, as a conv-style input would be.
    x = jax.random.normal(key, (2, 4, 16, 16), dtype=jnp.float32)

    # Deterministic "parameter" from the module __init__: scale_inv (scalar CONST).
    scale_inv = 0.25   # -> scale = 4.0

    # Conv activations are finite -> enable the finite-input fast path.
    z = quant_dequant(x, scale_inv, hp_dtype=jnp.bfloat16, assume_finite=True)
    z = jax.block_until_ready(z)

    assert z.shape == x.shape and z.dtype == jnp.bfloat16
    assert bool(jnp.all(jnp.isfinite(z.astype(jnp.float32))))

    # fp8-e4m3 relative resolution is 1/16; subnormal grid maps back to
    # 2^-9 / scale_inv = 1/128 here; bf16 adds ~0.4% more.
    err = jnp.abs(z.astype(jnp.float32) - x)
    tol = 0.1 * jnp.abs(x) + 0.05
    assert bool(jnp.all(err <= tol)), "quant-dequant error exceeds fp8 resolution bound"

    # Ragged size (not a multiple of 128): exercises the pad-free bulk+tail path
    # and the default (NaN-passthrough) kernel variant.
    x2 = jax.random.normal(jax.random.PRNGKey(1), (7, 100), dtype=jnp.float32)
    z2 = jax.block_until_ready(quant_dequant(x2, scale_inv))
    assert z2.shape == x2.shape and z2.dtype == jnp.bfloat16
    err2 = jnp.abs(z2.astype(jnp.float32) - x2)
    assert bool(jnp.all(err2 <= 0.1 * jnp.abs(x2) + 0.05))

    print("KERNEL_OK")
</pallas_src>

<mosaic_0001>
module attributes {stable_mosaic.version = 11 : i64} {
  func.func @_qdq_kernel(%arg0: i32, %arg1: memref<2x1024xf32, #tpu.memory_space<vmem>>, %arg2: memref<2x1024xbf16, #tpu.memory_space<vmem>>) attributes {dimension_semantics = [#tpu.dimension_semantics<parallel>], iteration_bounds = array<i64: 1>, scalar_prefetch = 0 : i64, scratch_operands = 0 : i64, tpu.core_type = #tpu.core_type<tc>, window_params = [{transform_indices = @transform_0, window_bounds = array<i64: 2, 1024>}, {transform_indices = @transform_1, window_bounds = array<i64: 2, 1024>}]} {
    %c0 = arith.constant 0 : index
    %c0_0 = arith.constant 0 : index
    %0 = vector.load %arg1[%c0, %c0_0] : memref<2x1024xf32, #tpu.memory_space<vmem>>, vector<2x1024xf32>
    %cst = arith.constant 2.500000e-01 : f32
    %1 = vector.broadcast %cst : f32 to vector<2x1024xf32>
    %2 = arith.mulf %0, %1 : vector<2x1024xf32>
    %3 = tpu.bitcast %2 : vector<2x1024xf32> -> vector<2x1024xi32>
    %c-2147483648_i32 = arith.constant -2147483648 : i32
    %4 = vector.broadcast %c-2147483648_i32 : i32 to vector<2x1024xi32>
    %5 = arith.andi %3, %4 : vector<2x1024xi32>
    %c2147483647_i32 = arith.constant 2147483647 : i32
    %6 = vector.broadcast %c2147483647_i32 : i32 to vector<2x1024xi32>
    %7 = arith.andi %3, %6 : vector<2x1024xi32>
    %8 = tpu.bitcast %7 : vector<2x1024xi32> -> vector<2x1024xf32>
    %cst_1 = arith.constant 4.480000e+02 : f32
    %9 = vector.broadcast %cst_1 : f32 to vector<2x1024xf32>
    %10 = arith.minimumf %8, %9 : vector<2x1024xf32>
    %11 = tpu.bitcast %10 : vector<2x1024xf32> -> vector<2x1024xi32>
    %c20_i32 = arith.constant 20 : i32
    %12 = vector.broadcast %c20_i32 : i32 to vector<2x1024xi32>
    %13 = arith.shrui %11, %12 : vector<2x1024xi32>
    %c1_i32 = arith.constant 1 : i32
    %14 = vector.broadcast %c1_i32 : i32 to vector<2x1024xi32>
    %15 = arith.andi %13, %14 : vector<2x1024xi32>
    %c524287_i32 = arith.constant 524287 : i32
    %16 = vector.broadcast %c524287_i32 : i32 to vector<2x1024xi32>
    %17 = arith.addi %11, %16 : vector<2x1024xi32>
    %18 = arith.addi %17, %15 : vector<2x1024xi32>
    %c-1048576_i32 = arith.constant -1048576 : i32
    %19 = vector.broadcast %c-1048576_i32 : i32 to vector<2x1024xi32>
    %20 = arith.andi %18, %19 : vector<2x1024xi32>
    %cst_2 = arith.constant 1.638400e+04 : f32
    %21 = vector.broadcast %cst_2 : f32 to vector<2x1024xf32>
    %22 = arith.addf %10, %21 : vector<2x1024xf32>
    %cst_3 = arith.constant 1.638400e+04 : f32
    %23 = vector.broadcast %cst_3 : f32 to vector<2x1024xf32>
    %24 = arith.subf %22, %23 : vector<2x1024xf32>
    %25 = tpu.bitcast %24 : vector<2x1024xf32> -> vector<2x1024xi32>
    %cst_4 = arith.constant 1.562500e-02 : f32
    %26 = vector.broadcast %cst_4 : f32 to vector<2x1024xf32>
    %27 = arith.cmpf olt, %10, %26 : vector<2x1024xf32>
    %28 = arith.select %27, %25, %20 : vector<2x1024xi1>, vector<2x1024xi32>
    %29 = arith.ori %28, %5 : vector<2x1024xi32>
    %30 = tpu.bitcast %29 : vector<2x1024xi32> -> vector<2x1024xf32>
    %cst_5 = arith.constant 4.000000e+00 : f32
    %31 = vector.broadcast %cst_5 : f32 to vector<2x1024xf32>
    %32 = arith.mulf %30, %31 : vector<2x1024xf32>
    %33 = arith.truncf %32 : vector<2x1024xf32> to vector<2x1024xbf16>
    %c0_6 = arith.constant 0 : index
    %c0_7 = arith.constant 0 : index
    %34 = vector.load %arg2[%c0_6, %c0_7] : memref<2x1024xbf16, #tpu.memory_space<vmem>>, vector<2x1024xbf16>
    tpu.vector_store %arg2[%c0_6, %c0_7], %33 {strides = array<i32>} : memref<2x1024xbf16, #tpu.memory_space<vmem>>, vector<2x1024xbf16>,
    return
  }
  func.func @transform_0(%arg0: i32) -> (i32, i32) {
    %c0_i32 = arith.constant 0 : i32
    %c0_i32_0 = arith.constant 0 : i32
    return %arg0, %c0_i32 : i32, i32
  }
  func.func @transform_1(%arg0: i32) -> (i32, i32) {
    %c0_i32 = arith.constant 0 : i32
    %c0_i32_0 = arith.constant 0 : i32
    return %arg0, %c0_i32 : i32, i32
  }
}

</mosaic_0001>

<bundles_post_ra>
// kernel: tpu_custom_call.1
= control target key start
LH: loop header
LB: loop body
LE: loop exit
PB: predicated region body
PF: predicated region fallthrough
CT: control target
= control target key end

     0   :  { %6 = vsyncpa [#allocation3], 0  ;;  %s501_s0 = inlined_call_operand.hbm [shape: f32[2,1024], index: 0, kind: input, shape index: {}]   ;;  %s502_s1 = inlined_call_operand.hbm [shape: bf16[2,1024], index: 1, kind: output, shape index: {}]  }
   0x1   :  { %7 = vsyncpa [#allocation4], 0  ;;  %s351_s6 = smov [#allocation2]   ;;  %s303_s10 = scalar_lea.hbm %s501_s0, 256 }
   0x2   :  { %s14_s7 = sshll.u32 %s351_s6, 4  ;;  %p304_p0 = scmp.ne.s32.totalorder %s501_s0, %s303_s10  ;;  %s15_s7 = int_to_ptr.vmem [resolvable:$true] %s14_s7 }
   0x3   :  { %p307_p1 = scmp.lt.u32.totalorder %s303_s10, %s501_s0 }
   0x5   :  { %p309_p2 = pnand %p307_p1, %p304_p0 }
   0x7   :  { %312 = shalt.err (!%p309_p2)
}
   0x8   :  { %s313_s15 = scalar_lea.vmem %s15_s7, 256  ;;  %p318_p4 = scmp.lt.s32.totalorder %s15_s7, %s15_s7 }
   0x9   :  { %p314_p3 = scmp.ne.s32.totalorder %s15_s7, %s313_s15  ;;  %p319_p5 = scmp.lt.s32.totalorder %s313_s15, %s313_s15 }
   0xb   :  { %p320_p6 = por %p319_p5, %p318_p4 }
   0xd   :  { %p321_p7 = pnand %p320_p6, %p314_p3 }
   0xf   :  { %324 = shalt.err (!%p321_p7)
}
  0x10   :  { %17 = dma.hbm_to_vmem [thread:$0]  %s501_s0, 256, %s15_s7, [#allocation3]  }
  0x11   :  { %347 = dma.done.wait [#allocation3], 256  }
  0x12   :  { %348 = vsyncadd [#allocation3], 4294967040  ;;  %v31_v0 = vlaneseq  ;;  %v352_v1 = vmov 1983009808   ;;  %v353_v5 = vmov 1966171168  }
  0x13   :  { %v29_v2 = vunpack.c.l.s4 %v352_v1  ;;  %v226_v6 = vunpack.c.l.s4 %v353_v5  ;;  %v21_v8 = vld [vmem:[#allocation2] sm:$0xff]  ;;  %v22_v9 = vld [vmem:[#allocation2 + $0x8] sm:$0xff]  ;;  %s354_s0 = smov [#allocation5]  }
  0x14   :  { %v32_v3 = vshrl.u32 %v31_v0, 7  ;;  %v23_v11 = vmul.f32 0.25, %v21_v8  ;;  %v24_v12 = vmul.f32 0.25, %v22_v9  ;;  %s278_s18 = sshll.u32 %s354_s0, 4  ;;  %s279_s18 = int_to_ptr.vmem [resolvable:$true] %s278_s18 }
  0x15   :  { %v30_v4 = vunpack.c.0.s8 %v29_v2  ;;  %v227_v10 = vunpack.c.0.s8 %v226_v6  ;;  %s325_s19 = scalar_lea.vmem %s279_s18, 128  ;;  %p330_p9 = scmp.lt.s32.totalorder %s279_s18, %s279_s18 }
  0x16   :  { %v27_v13 = vcombine.high %v23_v11, %v23_v11  ;;  %v44_v15 = vcombine.high %v24_v12, %v24_v12  ;;  %p326_p8 = scmp.ne.s32.totalorder %s279_s18, %s325_s19  ;;  %p331_p10 = scmp.lt.s32.totalorder %s325_s19, %s325_s19 }
  0x17   :  { %v33_v7 = vsub.s32 %v30_v4, %v32_v3  ;;  %v381_v17 = vsub.s32 %v227_v10, %v32_v3 }
  0x18   :  { %p332_p11 = por %p331_p10, %p330_p9 }
  0x19   :  { %v377_v14 = vrot.slane %v23_v11, %v33_v7  ;;  %v379_v16 = vrot.slane %v24_v12, %v33_v7  ;;  %v383_v18 = vrot.slane %v27_v13, %v33_v7  ;;  %v389_v20 = vrot.slane %v44_v15, %v33_v7 }
  0x1a   :  { %p333_p12 = pnand %p332_p11, %p326_p8 }
  0x1b   :  { %v387_v19 = vcombine.high %v377_v14, %v377_v14  ;;  %v393_v21 = vcombine.high %v379_v16, %v379_v16  ;;  %v61_v22 = vand.u32 2147483648, %v377_v14  ;;  %v65_v23 = vand.u32 2147483648, %v379_v16 }
  0x1c   :  { %v69_v24 = vand.u32 2147483647, %v377_v14  ;;  %v73_v25 = vand.u32 2147483647, %v379_v16  ;;  %v401_v26 = vcombine.high %v383_v18, %v383_v18  ;;  %v405_v27 = vcombine.high %v389_v20, %v389_v20 }
  0x1d   :  { %v62_v28 = vand.u32 2147483648, %v387_v19  ;;  %v63_v29 = vand.u32 2147483648, %v383_v18  ;;  %v66_v30 = vand.u32 2147483648, %v393_v21  ;;  %v67_v31 = vand.u32 2147483648, %v389_v20 }
  0x1e   :  { %v70_v32 = vand.u32 2147483647, %v387_v19  ;;  %v71_v33 = vand.u32 2147483647, %v383_v18  ;;  %v64_v34 = vand.u32 2147483648, %v401_v26  ;;  %v68_v35 = vand.u32 2147483648, %v405_v27 }
  0x1f   :  { %v72_v36 = vand.u32 2147483647, %v401_v26  ;;  %v74_v37 = vand.u32 2147483647, %v393_v21  ;;  %v75_v38 = vand.u32 2147483647, %v389_v20 }
  0x20   :  { %v76_v39 = vand.u32 2147483647, %v405_v27  ;;  %v419_v40 = vmin.f32 %v69_v24, 448.0  ;;  %v421_v41 = vmin.f32 %v70_v32, 448.0  ;;  %v423_v42 = vmin.f32 %v71_v33, 448.0 }
  0x21   :  { %v425_v43 = vmin.f32 %v72_v36, 448.0  ;;  %v427_v44 = vmin.f32 %v73_v25, 448.0  ;;  %v429_v45 = vmin.f32 %v74_v37, 448.0  ;;  %v431_v46 = vmin.f32 %v75_v38, 448.0 }
  0x22   :  { %v433_v47 = vmin.f32 %v76_v39, 448.0  ;;  %v101_v48 = vshrl.u32 %v419_v40, 20  ;;  %v102_v49 = vshrl.u32 %v421_v41, 20  ;;  %v103_v50 = vshrl.u32 %v423_v42, 20 }
  0x23   :  { %v104_v51 = vshrl.u32 %v425_v43, 20  ;;  %v105_v52 = vshrl.u32 %v427_v44, 20  ;;  %v106_v53 = vshrl.u32 %v429_v45, 20  ;;  %v107_v54 = vshrl.u32 %v431_v46, 20 }
  0x24   :  { %v108_v55 = vshrl.u32 %v433_v47, 20  ;;  %v109_v56 = vand.u32 1, %v101_v48  ;;  %v110_v57 = vand.u32 1, %v102_v49  ;;  %v111_v58 = vand.u32 1, %v103_v50 }
  0x25   :  { %v112_v59 = vand.u32 1, %v104_v51  ;;  %v113_v60 = vand.u32 1, %v105_v52  ;;  %v114_v61 = vand.u32 1, %v106_v53  ;;  %v115_v62 = vand.u32 1, %v107_v54 }
  0x26   :  { %v116_v63 = vand.u32 1, %v108_v55  ;;  %v117_v0 = vadd.s32 524287, %v419_v40  ;;  %v118_v1 = vadd.s32 524287, %v421_v41  ;;  %v119_v2 = vadd.s32 524287, %v423_v42 }
  0x27   :  { %v120_v3 = vadd.s32 524287, %v425_v43  ;;  %v121_v4 = vadd.s32 524287, %v427_v44  ;;  %v122_v5 = vadd.s32 524287, %v429_v45  ;;  %v123_v6 = vadd.s32 524287, %v431_v46 }
  0x28   :  { %v124_v7 = vadd.s32 524287, %v433_v47  ;;  %v125_v8 = vadd.s32 %v117_v0, %v109_v56  ;;  %v126_v9 = vadd.s32 %v118_v1, %v110_v57  ;;  %v127_v10 = vadd.s32 %v119_v2, %v111_v58 }
  0x29   :  { %v128_v11 = vadd.s32 %v120_v3, %v112_v59  ;;  %v129_v12 = vadd.s32 %v121_v4, %v113_v60  ;;  %v130_v13 = vadd.s32 %v122_v5, %v114_v61  ;;  %v131_v15 = vadd.s32 %v123_v6, %v115_v62 }
  0x2a   :  { %v132_v24 = vadd.s32 %v124_v7, %v116_v63  ;;  %v133_v25 = vand.u32 4293918720, %v125_v8  ;;  %v134_v32 = vand.u32 4293918720, %v126_v9  ;;  %v135_v33 = vand.u32 4293918720, %v127_v10 }
  0x2b   :  { %v136_v36 = vand.u32 4293918720, %v128_v11  ;;  %v137_v37 = vand.u32 4293918720, %v129_v12  ;;  %v138_v38 = vand.u32 4293918720, %v130_v13  ;;  %v139_v39 = vand.u32 4293918720, %v131_v15 }
  0x2c   :  { %v140_v48 = vand.u32 4293918720, %v132_v24  ;;  %v141_v49 = vadd.f32 16384.0, %v419_v40  ;;  %v142_v50 = vadd.f32 16384.0, %v421_v41  ;;  %v143_v51 = vadd.f32 16384.0, %v423_v42 }
  0x2d   :  { %v144_v52 = vadd.f32 16384.0, %v425_v43  ;;  %v145_v53 = vadd.f32 16384.0, %v427_v44  ;;  %v146_v54 = vadd.f32 16384.0, %v429_v45  ;;  %v147_v55 = vadd.f32 16384.0, %v431_v46 }
  0x2e   :  { %v148_v56 = vadd.f32 16384.0, %v433_v47  ;;  %v287_v57 = vadd.f32 -16384.0, %v141_v49  ;;  %v288_v58 = vadd.f32 -16384.0, %v142_v50  ;;  %v289_v59 = vadd.f32 -16384.0, %v143_v51 }
  0x2f   :  { %v290_v60 = vadd.f32 -16384.0, %v144_v52  ;;  %v291_v61 = vadd.f32 -16384.0, %v145_v53  ;;  %v292_v62 = vadd.f32 -16384.0, %v146_v54  ;;  %v293_v63 = vadd.f32 -16384.0, %v147_v55 }
  0x30   :  { %v294_v0 = vadd.f32 -16384.0, %v148_v56  ;;  %vm165_vm0 = vcmp.lt.f32.partialorder %v419_v40, 0.015625  ;;  %vm166_vm1 = vcmp.lt.f32.partialorder %v421_v41, 0.015625  ;;  %vm167_vm2 = vcmp.lt.f32.partialorder %v423_v42, 0.015625 }
  0x31   :  { %vm168_vm3 = vcmp.lt.f32.partialorder %v425_v43, 0.015625  ;;  %vm169_vm4 = vcmp.lt.f32.partialorder %v427_v44, 0.015625  ;;  %vm170_vm5 = vcmp.lt.f32.partialorder %v429_v45, 0.015625  ;;  %vm171_vm6 = vcmp.lt.f32.partialorder %v431_v46, 0.015625 }
  0x32   :  { %vm172_vm7 = vcmp.lt.f32.partialorder %v433_v47, 0.015625  ;;  %v173_v1 = vsel %vm165_vm0, %v287_v57, %v133_v25  ;;  %v174_v2 = vsel %vm166_vm1, %v288_v58, %v134_v32  ;;  %v175_v3 = vsel %vm167_vm2, %v289_v59, %v135_v33 }
  0x33   :  { %v176_v4 = vsel %vm168_vm3, %v290_v60, %v136_v36  ;;  %v177_v5 = vsel %vm169_vm4, %v291_v61, %v137_v37  ;;  %v178_v40 = vsel %vm170_vm5, %v292_v62, %v138_v38  ;;  %v179_v6 = vsel %vm171_vm6, %v293_v63, %v139_v39 }
  0x34   :  { %v180_v41 = vsel %vm172_vm7, %v294_v0, %v140_v48  ;;  %v181_v42 = vor.u32 %v173_v1, %v61_v22  ;;  %v182_v43 = vor.u32 %v174_v2, %v62_v28  ;;  %v183_v44 = vor.u32 %v175_v3, %v63_v29 }
  0x35   :  { %v184_v45 = vor.u32 %v176_v4, %v64_v34  ;;  %v185_v46 = vor.u32 %v177_v5, %v65_v23  ;;  %v186_v47 = vor.u32 %v178_v40, %v66_v30  ;;  %v187_v7 = vor.u32 %v179_v6, %v67_v31 }
  0x36   :  { %v188_v14 = vor.u32 %v180_v41, %v68_v35  ;;  %v197_v19 = vmul.f32 4.0, %v181_v42  ;;  %v198_v22 = vmul.f32 4.0, %v182_v43  ;;  %v199_v28 = vmul.f32 4.0, %v183_v44 }
  0x37   :  { %v200_v18 = vmul.f32 4.0, %v184_v45  ;;  %v201_v29 = vmul.f32 4.0, %v185_v46  ;;  %v202_v8 = vmul.f32 4.0, %v186_v47  ;;  %v203_v26 = vmul.f32 4.0, %v187_v7 }
  0x38   :  { %v204_v34 = vmul.f32 4.0, %v188_v14  ;;  %v295_v9 = vpack.c.bf16 %v198_v22, %v197_v19 }
  0x39   :  { %v296_v16 = vpack.c.bf16 %v200_v18, %v199_v28  ;;  %v297_v23 = vpack.c.bf16 %v202_v8, %v201_v29 }
  0x3a   :  { %v298_v10 = vpack.c.bf16 %v204_v34, %v203_v26  ;;  %v231_v21 = vrot.slane %v295_v9, %v381_v17 }
  0x3b   :  { %v238_v20 = vrot.slane %v296_v16, %v381_v17  ;;  %v245_v30 = vrot.slane %v297_v23, %v381_v17 }
  0x3c   :  { %v252_v27 = vrot.slane %v298_v10, %v381_v17 }
  0x3d   :  { %v253_v31 = vcombine.low %v231_v21, %v238_v20 }
  0x3e   :  { %v254_v35 = vcombine.low %v245_v30, %v252_v27 }
  0x3f   :  { %v261_v11 = vrot.slane %v253_v31, %v381_v17 }
  0x40   :  { %v268_v12 = vrot.slane %v254_v35, %v381_v17 }
  0x42   :  { %v269_v13 = vcombine.low %v261_v11, %v268_v12 }
  0x44   :  { %271 = vst [vmem:[#allocation5] sm:$0xff] %v269_v13 }
  0x45   :  { %336 = shalt.err (!%p333_p12)
}
  0x46   :  { %s337_s22 = scalar_lea.hbm %s502_s1, 128 }
  0x47   :  { %p338_p13 = scmp.ne.s32.totalorder %s502_s1, %s337_s22  ;;  %p341_p0 = scmp.lt.u32.totalorder %s337_s22, %s502_s1 }
  0x49   :  { %p343_p1 = pnand %p341_p0, %p338_p13 }
  0x4b   :  { %346 = shalt.err (!%p343_p1)
}
  0x4c   :  { %281 = dma.vmem_to_hbm [thread:$0]  %s279_s18, 128, %s502_s1, [#allocation4]  }
  0x4d   :  { %349 = dma.done.wait [#allocation4], 128  }
  0x4e   :  { %350 = vsyncadd [#allocation4], 4294967168 }
  0x4f   :  { %285 = vsyncpa [#allocation3], 1 }
  0x50   :  { %286 = vsyncpa [#allocation4], 1 }

</bundles_post_ra>
